<compile_context>
chip_gen: v7x
topology: tpu7x:2x2x1
jax: 0.10.0
libtpu: 0.0.40
codegen_flags: <defaults>
</compile_context>

<pallas_src>
import math

import jax
import jax.numpy as jnp
import numpy as np
from jax.experimental import pallas as pl
from jax.experimental.pallas import tpu as pltpu

# ---------------- model hyper-parameters (small, consistent with the module) ----
B = 2            # batch
S = 8            # sequence length
D = 32           # d_model ("size")
H = 4            # attention heads
DK = D // H      # per-head dim
FF = 64          # feed-forward hidden dim
BS = B * S       # folded batch*sequence rows (matmuls only; attention is per-batch)
QKV = 3 * D      # fused qkv width (= 96)
G = B * H        # attention groups
EPS = 1e-6
NEG_INF = -1e9


# ---------------------------- Pallas kernel --------------------------------
def decoder_layer_kernel(x_ref, mask_ref, wqkv_ref, wo_ref, w1_ref, w2_ref,
                         vecs_ref, o_ref):
    x = x_ref[...]             # (BS, D)
    mask_add = mask_ref[...]   # (S, S) additive mask: 0 = attend, -1e9 = masked
    vecs = vecs_ref[...]       # (8, QKV) packed LN scales / biases

    ln1_a = vecs[0:1, 0:D]
    ln1_b = vecs[1:2, 0:D]
    ln2_a = vecs[2:3, 0:D]
    ln2_b = vecs[3:4, 0:D]
    bo    = vecs[4:5, 0:D]
    b2    = vecs[5:6, 0:D]
    b1    = vecs[6:7, 0:FF]
    bqkv  = vecs[7:8, 0:QKV]

    def layer_norm(v, a, b):
        mean = jnp.mean(v, axis=-1, keepdims=True)
        # torch.std default is unbiased (ddof=1); denominator is (std + eps)
        var = jnp.sum((v - mean) ** 2, axis=-1, keepdims=True) * (1.0 / (v.shape[-1] - 1))
        inv = pl.reciprocal(jnp.sqrt(var) + EPS)          # exact; EUP path, no divide
        return (v - mean) * (a * inv) + b

    # ---- sublayer 0: x + SelfAttn(LN(x), tgt_mask) ----
    xn = layer_norm(x, ln1_a, ln1_b)
    # single fused 2-D QKV matmul; columns are grouped per head as [q|k|v],
    # with the 1/sqrt(DK) scale already folded into the q columns.
    qkv = jnp.dot(xn, wqkv_ref[...], preferred_element_type=jnp.float32) + bqkv   # (BS, QKV)

    # build (B*H, S, 3*DK) groups (static unroll; cheap copies, no transposes)
    groups = []
    for b in range(B):
        for h in range(H):
            groups.append(qkv[b * S:(b + 1) * S, h * 3 * DK:(h + 1) * 3 * DK])
    g = jnp.stack(groups, axis=0)                         # (G, S, 3*DK)
    q = g[:, :, 0:DK]
    k = g[:, :, DK:2 * DK]
    v = g[:, :, 2 * DK:3 * DK]

    # batched-over-(batch,head) attention: scores are (G, S, S), no cross-batch waste
    s = jnp.einsum("gqd,gkd->gqk", q, k, preferred_element_type=jnp.float32)
    s = s + mask_add[None]                                # additive mask (single VPU add)
    s = s - jnp.max(s, axis=-1, keepdims=True)
    p = jnp.exp(s)
    p = p * pl.reciprocal(jnp.sum(p, axis=-1, keepdims=True))
    attn = jnp.einsum("gqk,gkd->gqd", p, v, preferred_element_type=jnp.float32)   # (G, S, DK)

    # lane-concat heads back to (BS, D); one (BS,D)@(D,D) matmul does the head reduction
    rows = []
    for b in range(B):
        rows.append(jnp.concatenate([attn[b * H + h] for h in range(H)], axis=-1))  # (S, D)
    attn2d = jnp.concatenate(rows, axis=0)                # (BS, D)

    x = x + jnp.dot(attn2d, wo_ref[...], preferred_element_type=jnp.float32) + bo

    # ---- sublayer 1: x + FFN(LN(x)) ----
    xn2 = layer_norm(x, ln2_a, ln2_b)
    h1 = jnp.maximum(jnp.dot(xn2, w1_ref[...], preferred_element_type=jnp.float32) + b1, 0.0)
    ff = jnp.dot(h1, w2_ref[...], preferred_element_type=jnp.float32) + b2

    o_ref[...] = x + ff


# ------------------------------ packing (hoisted, runs once) -----------------
def pack_inputs(params, tgt_mask):
    """Pure-JAX repacking of parameters + mask. Called ONCE outside the per-call path."""
    scale = 1.0 / math.sqrt(DK)

    # (D, H, 3*DK): per-head column groups [q|k|v], attention scale folded into q
    wq_h = (params["wq"] * scale).reshape(D, H, DK)
    wk_h = params["wk"].reshape(D, H, DK)
    wv_h = params["wv"].reshape(D, H, DK)
    wqkv = jnp.concatenate([wq_h, wk_h, wv_h], axis=-1).reshape(D, QKV)      # (D, 96)

    bq_h = (params["bq"] * scale).reshape(H, DK)
    bk_h = params["bk"].reshape(H, DK)
    bv_h = params["bv"].reshape(H, DK)
    bqkv = jnp.concatenate([bq_h, bk_h, bv_h], axis=-1).reshape(1, QKV)      # (1, 96)

    def pad_row(v):
        return jnp.pad(v, ((0, 0), (0, QKV - v.shape[1])))

    vecs = jnp.concatenate([
        pad_row(params["ln1_a"]), pad_row(params["ln1_b"]),
        pad_row(params["ln2_a"]), pad_row(params["ln2_b"]),
        pad_row(params["bo"]), pad_row(params["b2"]),
        pad_row(params["b1"]), bqkv], axis=0)                                # (8, 96)

    # additive mask: 0 where attend, -1e9 where masked
    mask_add = (tgt_mask[0] - 1.0) * 1e9                                     # (S, S)

    return mask_add, wqkv, params["wo"], params["w1"], params["w2"], vecs


# ------------------------------ wrapper -------------------------------------
@jax.jit
def decoder_layer(x, mask_add, wqkv, wo, w1, w2, vecs):
    """x: (B, S, D) f32; all other args are pre-packed (see pack_inputs)."""
    x2d = x.reshape(BS, D)
    vmem = pl.BlockSpec(memory_space=pltpu.MemorySpace.VMEM)
    out2d = pl.pallas_call(
        decoder_layer_kernel,
        out_shape=jax.ShapeDtypeStruct((BS, D), jnp.float32),
        in_specs=[vmem] * 7,
        out_specs=vmem,
    )(x2d, mask_add, wqkv, wo, w1, w2, vecs)
    return out2d.reshape(B, S, D)


# --------------------------- pure-JAX reference ------------------------------
def reference(x, mask, p):
    def ln(v, a, b):
        mean = v.mean(-1, keepdims=True)
        var = ((v - mean) ** 2).sum(-1, keepdims=True) / (v.shape[-1] - 1)
        return a * (v - mean) / (jnp.sqrt(var) + EPS) + b

    xn = ln(x, p["ln1_a"], p["ln1_b"])
    q = xn @ p["wq"] + p["bq"]
    k = xn @ p["wk"] + p["bk"]
    v = xn @ p["wv"] + p["bv"]
    q = q.reshape(B, S, H, DK).transpose(0, 2, 1, 3)
    k = k.reshape(B, S, H, DK).transpose(0, 2, 1, 3)
    v = v.reshape(B, S, H, DK).transpose(0, 2, 1, 3)
    s = jnp.einsum("bhqd,bhkd->bhqk", q, k) / math.sqrt(DK)
    s = jnp.where(mask[:, None] > 0, s, NEG_INF)
    pr = jax.nn.softmax(s, axis=-1)
    a = jnp.einsum("bhqk,bhkd->bhqd", pr, v).transpose(0, 2, 1, 3).reshape(B, S, D)
    x = x + (a @ p["wo"] + p["bo"])
    xn2 = ln(x, p["ln2_a"], p["ln2_b"])
    ff = jnp.maximum(xn2 @ p["w1"] + p["b1"], 0.0) @ p["w2"] + p["b2"]
    return x + ff


# ------------------------------ main -----------------------------------------
if __name__ == "__main__":
    key = jax.random.PRNGKey(0)
    ks = jax.random.split(key, 13)

    def w(k, shape, scale=0.02):
        return (scale * jax.random.normal(k, shape)).astype(jnp.float32)

    params = {
        "ln1_a": jnp.ones((1, D), jnp.float32),
        "ln1_b": jnp.zeros((1, D), jnp.float32),
        "wq": w(ks[0], (D, D)), "bq": w(ks[1], (1, D)),
        "wk": w(ks[2], (D, D)), "bk": w(ks[3], (1, D)),
        "wv": w(ks[4], (D, D)), "bv": w(ks[5], (1, D)),
        "wo": w(ks[6], (D, D)), "bo": w(ks[7], (1, D)),
        "ln2_a": jnp.ones((1, D), jnp.float32),
        "ln2_b": jnp.zeros((1, D), jnp.float32),
        "w1": w(ks[8], (D, FF)), "b1": w(ks[9], (1, FF)),
        "w2": w(ks[10], (FF, D)), "b2": w(ks[11], (1, D)),
    }

    x = jax.random.normal(ks[12], (B, S, D), jnp.float32)
    tgt_mask = jnp.tril(jnp.ones((S, S), jnp.float32))[None]   # (1, S, S) causal

    # Hoisted packing: depends only on params / tgt_mask, runs once (not per call).
    packed = pack_inputs(params, tgt_mask)

    out = decoder_layer(x, *packed)
    out = jax.block_until_ready(out)

    ref = reference(x, tgt_mask, params)
    np.testing.assert_allclose(np.asarray(out), np.asarray(ref), rtol=1e-4, atol=1e-4)

    print("KERNEL_OK")
</pallas_src>

<mosaic_0001>
module attributes {stable_mosaic.version = 11 : i64} {
  func.func @decoder_layer_kernel(%arg0: memref<16x32xf32, #tpu.memory_space<vmem>>, %arg1: memref<8x8xf32, #tpu.memory_space<vmem>>, %arg2: memref<32x96xf32, #tpu.memory_space<vmem>>, %arg3: memref<32x32xf32, #tpu.memory_space<vmem>>, %arg4: memref<32x64xf32, #tpu.memory_space<vmem>>, %arg5: memref<64x32xf32, #tpu.memory_space<vmem>>, %arg6: memref<8x96xf32, #tpu.memory_space<vmem>>, %arg7: memref<16x32xf32, #tpu.memory_space<vmem>>) attributes {dimension_semantics = [], scalar_prefetch = 0 : i64, scratch_operands = 0 : i64, tpu.core_type = #tpu.core_type<tc>} {
    %c0 = arith.constant 0 : index
    %c0_0 = arith.constant 0 : index
    %0 = vector.load %arg0[%c0, %c0_0] : memref<16x32xf32, #tpu.memory_space<vmem>>, vector<16x32xf32>
    %c0_1 = arith.constant 0 : index
    %c0_2 = arith.constant 0 : index
    %1 = vector.load %arg1[%c0_1, %c0_2] : memref<8x8xf32, #tpu.memory_space<vmem>>, vector<8x8xf32>
    %c0_3 = arith.constant 0 : index
    %c0_4 = arith.constant 0 : index
    %2 = vector.load %arg6[%c0_3, %c0_4] : memref<8x96xf32, #tpu.memory_space<vmem>>, vector<8x96xf32>
    %3 = vector.extract_strided_slice %2 {offsets = [0, 0], sizes = [1, 32], strides = [1, 1]} : vector<8x96xf32> to vector<1x32xf32>
    %4 = vector.extract_strided_slice %2 {offsets = [1, 0], sizes = [1, 32], strides = [1, 1]} : vector<8x96xf32> to vector<1x32xf32>
    %5 = vector.extract_strided_slice %2 {offsets = [2, 0], sizes = [1, 32], strides = [1, 1]} : vector<8x96xf32> to vector<1x32xf32>
    %6 = vector.extract_strided_slice %2 {offsets = [3, 0], sizes = [1, 32], strides = [1, 1]} : vector<8x96xf32> to vector<1x32xf32>
    %7 = vector.extract_strided_slice %2 {offsets = [4, 0], sizes = [1, 32], strides = [1, 1]} : vector<8x96xf32> to vector<1x32xf32>
    %8 = vector.extract_strided_slice %2 {offsets = [5, 0], sizes = [1, 32], strides = [1, 1]} : vector<8x96xf32> to vector<1x32xf32>
    %9 = vector.extract_strided_slice %2 {offsets = [6, 0], sizes = [1, 64], strides = [1, 1]} : vector<8x96xf32> to vector<1x64xf32>
    %10 = vector.extract_strided_slice %2 {offsets = [7, 0], sizes = [1, 96], strides = [1, 1]} : vector<8x96xf32> to vector<1x96xf32>
    %cst = arith.constant dense<0.000000e+00> : vector<16xf32>
    %11 = vector.multi_reduction <add>, %0, %cst [1] : vector<16x32xf32> to vector<16xf32>
    %12 = vector.shape_cast %11 : vector<16xf32> to vector<16x1xf32>
    %cst_5 = arith.constant 3.200000e+01 : f32
    %13 = vector.broadcast %cst_5 : f32 to vector<16x1xf32>
    %14 = arith.divf %12, %13 : vector<16x1xf32>
    %15 = vector.broadcast %14 : vector<16x1xf32> to vector<16x32xf32>
    %16 = arith.subf %0, %15 : vector<16x32xf32>
    %17 = arith.mulf %16, %16 : vector<16x32xf32>
    %cst_6 = arith.constant dense<0.000000e+00> : vector<16xf32>
    %18 = vector.multi_reduction <add>, %17, %cst_6 [1] : vector<16x32xf32> to vector<16xf32>
    %19 = vector.shape_cast %18 : vector<16xf32> to vector<16x1xf32>
    %cst_7 = arith.constant 0.0322580636 : f32
    %20 = vector.broadcast %cst_7 : f32 to vector<16x1xf32>
    %21 = arith.mulf %19, %20 : vector<16x1xf32>
    %22 = math.sqrt %21 : vector<16x1xf32>
    %cst_8 = arith.constant 9.99999997E-7 : f32
    %23 = vector.broadcast %cst_8 : f32 to vector<16x1xf32>
    %24 = arith.addf %22, %23 : vector<16x1xf32>
    %25 = tpu.reciprocal %24 : vector<16x1xf32> -> vector<16x1xf32>
    %26 = vector.broadcast %14 : vector<16x1xf32> to vector<16x32xf32>
    %27 = arith.subf %0, %26 : vector<16x32xf32>
    %28 = vector.broadcast %3 : vector<1x32xf32> to vector<16x32xf32>
    %29 = vector.broadcast %25 : vector<16x1xf32> to vector<16x32xf32>
    %30 = arith.mulf %28, %29 : vector<16x32xf32>
    %31 = arith.mulf %27, %30 : vector<16x32xf32>
    %32 = vector.broadcast %4 : vector<1x32xf32> to vector<16x32xf32>
    %33 = arith.addf %31, %32 : vector<16x32xf32>
    %c0_9 = arith.constant 0 : index
    %c0_10 = arith.constant 0 : index
    %34 = vector.load %arg2[%c0_9, %c0_10] : memref<32x96xf32, #tpu.memory_space<vmem>>, vector<32x96xf32>
    %cst_11 = arith.constant dense<0.000000e+00> : vector<16x96xf32>
    %35 = tpu.matmul %33, %34, %cst_11 {dimension_numbers = #tpu.dot_dimension_numbers<[1], [0], [0], [1], [0, 0, 1, 1], [], []>} : vector<16x32xf32>, vector<32x96xf32>, vector<16x96xf32> -> vector<16x96xf32>
    %36 = vector.broadcast %10 : vector<1x96xf32> to vector<16x96xf32>
    %37 = arith.addf %35, %36 : vector<16x96xf32>
    %38 = vector.extract_strided_slice %37 {offsets = [0, 0], sizes = [8, 24], strides = [1, 1]} : vector<16x96xf32> to vector<8x24xf32>
    %39 = vector.extract_strided_slice %37 {offsets = [0, 24], sizes = [8, 24], strides = [1, 1]} : vector<16x96xf32> to vector<8x24xf32>
    %40 = vector.extract_strided_slice %37 {offsets = [0, 48], sizes = [8, 24], strides = [1, 1]} : vector<16x96xf32> to vector<8x24xf32>
    %41 = vector.extract_strided_slice %37 {offsets = [0, 72], sizes = [8, 24], strides = [1, 1]} : vector<16x96xf32> to vector<8x24xf32>
    %42 = vector.extract_strided_slice %37 {offsets = [8, 0], sizes = [8, 24], strides = [1, 1]} : vector<16x96xf32> to vector<8x24xf32>
    %43 = vector.extract_strided_slice %37 {offsets = [8, 24], sizes = [8, 24], strides = [1, 1]} : vector<16x96xf32> to vector<8x24xf32>
    %44 = vector.extract_strided_slice %37 {offsets = [8, 48], sizes = [8, 24], strides = [1, 1]} : vector<16x96xf32> to vector<8x24xf32>
    %45 = vector.extract_strided_slice %37 {offsets = [8, 72], sizes = [8, 24], strides = [1, 1]} : vector<16x96xf32> to vector<8x24xf32>
    %46 = vector.shape_cast %38 : vector<8x24xf32> to vector<1x8x24xf32>
    %47 = vector.shape_cast %39 : vector<8x24xf32> to vector<1x8x24xf32>
    %48 = vector.shape_cast %40 : vector<8x24xf32> to vector<1x8x24xf32>
    %49 = vector.shape_cast %41 : vector<8x24xf32> to vector<1x8x24xf32>
    %50 = vector.shape_cast %42 : vector<8x24xf32> to vector<1x8x24xf32>
    %51 = vector.shape_cast %43 : vector<8x24xf32> to vector<1x8x24xf32>
    %52 = vector.shape_cast %44 : vector<8x24xf32> to vector<1x8x24xf32>
    %53 = vector.shape_cast %45 : vector<8x24xf32> to vector<1x8x24xf32>
    %54 = tpu.concatenate %46, %47, %48, %49, %50, %51, %52, %53 in 0 : vector<1x8x24xf32>, vector<1x8x24xf32>, vector<1x8x24xf32>, vector<1x8x24xf32>, vector<1x8x24xf32>, vector<1x8x24xf32>, vector<1x8x24xf32>, vector<1x8x24xf32> -> vector<8x8x24xf32>
    %55 = vector.extract_strided_slice %54 {offsets = [0, 0, 0], sizes = [8, 8, 8], strides = [1, 1, 1]} : vector<8x8x24xf32> to vector<8x8x8xf32>
    %56 = vector.extract_strided_slice %54 {offsets = [0, 0, 8], sizes = [8, 8, 8], strides = [1, 1, 1]} : vector<8x8x24xf32> to vector<8x8x8xf32>
    %57 = vector.extract_strided_slice %54 {offsets = [0, 0, 16], sizes = [8, 8, 8], strides = [1, 1, 1]} : vector<8x8x24xf32> to vector<8x8x8xf32>
    "tpu.trace_start"() <{level = 10 : i32, message = "gqd,gkd->gqk"}> : () -> ()
    %cst_12 = arith.constant dense<0.000000e+00> : vector<8x8x8xf32>
    %58 = tpu.matmul %55, %56, %cst_12 {dimension_numbers = #tpu.dot_dimension_numbers<[2], [2], [1], [1], [0, 0, 0, 1, 1, 1], [0], [0]>} : vector<8x8x8xf32>, vector<8x8x8xf32>, vector<8x8x8xf32> -> vector<8x8x8xf32>
    "tpu.trace_stop"() : () -> ()
    %59 = vector.shape_cast %1 : vector<8x8xf32> to vector<1x8x8xf32>
    %60 = vector.broadcast %59 : vector<1x8x8xf32> to vector<8x8x8xf32>
    %61 = arith.addf %58, %60 : vector<8x8x8xf32>
    %cst_13 = arith.constant dense<0xFF800000> : vector<8x8xf32>
    %62 = vector.multi_reduction <maximumf>, %61, %cst_13 [2] : vector<8x8x8xf32> to vector<8x8xf32>
    %63 = vector.shape_cast %62 : vector<8x8xf32> to vector<8x8x1xf32>
    %64 = vector.broadcast %63 : vector<8x8x1xf32> to vector<8x8x8xf32>
    %65 = arith.subf %61, %64 : vector<8x8x8xf32>
    %66 = math.exp %65 : vector<8x8x8xf32>
    %cst_14 = arith.constant dense<0.000000e+00> : vector<8x8xf32>
    %67 = vector.multi_reduction <add>, %66, %cst_14 [2] : vector<8x8x8xf32> to vector<8x8xf32>
    %68 = vector.shape_cast %67 : vector<8x8xf32> to vector<8x8x1xf32>
    %69 = tpu.reciprocal %68 : vector<8x8x1xf32> -> vector<8x8x1xf32>
    %70 = vector.broadcast %69 : vector<8x8x1xf32> to vector<8x8x8xf32>
    %71 = arith.mulf %66, %70 : vector<8x8x8xf32>
    "tpu.trace_start"() <{level = 10 : i32, message = "gqk,gkd->gqd"}> : () -> ()
    %cst_15 = arith.constant dense<0.000000e+00> : vector<8x8x8xf32>
    %72 = tpu.matmul %71, %57, %cst_15 {dimension_numbers = #tpu.dot_dimension_numbers<[2], [1], [1], [2], [0, 0, 0, 1, 1, 2], [0], [0]>} : vector<8x8x8xf32>, vector<8x8x8xf32>, vector<8x8x8xf32> -> vector<8x8x8xf32>
    "tpu.trace_stop"() : () -> ()
    %73 = vector.extract_strided_slice %72 {offsets = [0, 0, 0], sizes = [1, 8, 8], strides = [1, 1, 1]} : vector<8x8x8xf32> to vector<1x8x8xf32>
    %74 = vector.shape_cast %73 : vector<1x8x8xf32> to vector<8x8xf32>
    %75 = vector.extract_strided_slice %72 {offsets = [1, 0, 0], sizes = [1, 8, 8], strides = [1, 1, 1]} : vector<8x8x8xf32> to vector<1x8x8xf32>
    %76 = vector.shape_cast %75 : vector<1x8x8xf32> to vector<8x8xf32>
    %77 = vector.extract_strided_slice %72 {offsets = [2, 0, 0], sizes = [1, 8, 8], strides = [1, 1, 1]} : vector<8x8x8xf32> to vector<1x8x8xf32>
    %78 = vector.shape_cast %77 : vector<1x8x8xf32> to vector<8x8xf32>
    %79 = vector.extract_strided_slice %72 {offsets = [3, 0, 0], sizes = [1, 8, 8], strides = [1, 1, 1]} : vector<8x8x8xf32> to vector<1x8x8xf32>
    %80 = vector.shape_cast %79 : vector<1x8x8xf32> to vector<8x8xf32>
    %81 = tpu.concatenate %74, %76, %78, %80 in 1 : vector<8x8xf32>, vector<8x8xf32>, vector<8x8xf32>, vector<8x8xf32> -> vector<8x32xf32>
    %82 = vector.extract_strided_slice %72 {offsets = [4, 0, 0], sizes = [1, 8, 8], strides = [1, 1, 1]} : vector<8x8x8xf32> to vector<1x8x8xf32>
    %83 = vector.shape_cast %82 : vector<1x8x8xf32> to vector<8x8xf32>
    %84 = vector.extract_strided_slice %72 {offsets = [5, 0, 0], sizes = [1, 8, 8], strides = [1, 1, 1]} : vector<8x8x8xf32> to vector<1x8x8xf32>
    %85 = vector.shape_cast %84 : vector<1x8x8xf32> to vector<8x8xf32>
    %86 = vector.extract_strided_slice %72 {offsets = [6, 0, 0], sizes = [1, 8, 8], strides = [1, 1, 1]} : vector<8x8x8xf32> to vector<1x8x8xf32>
    %87 = vector.shape_cast %86 : vector<1x8x8xf32> to vector<8x8xf32>
    %88 = vector.extract_strided_slice %72 {offsets = [7, 0, 0], sizes = [1, 8, 8], strides = [1, 1, 1]} : vector<8x8x8xf32> to vector<1x8x8xf32>
    %89 = vector.shape_cast %88 : vector<1x8x8xf32> to vector<8x8xf32>
    %90 = tpu.concatenate %83, %85, %87, %89 in 1 : vector<8x8xf32>, vector<8x8xf32>, vector<8x8xf32>, vector<8x8xf32> -> vector<8x32xf32>
    %91 = tpu.concatenate %81, %90 in 0 : vector<8x32xf32>, vector<8x32xf32> -> vector<16x32xf32>
    %c0_16 = arith.constant 0 : index
    %c0_17 = arith.constant 0 : index
    %92 = vector.load %arg3[%c0_16, %c0_17] : memref<32x32xf32, #tpu.memory_space<vmem>>, vector<32x32xf32>
    %cst_18 = arith.constant dense<0.000000e+00> : vector<16x32xf32>
    %93 = tpu.matmul %91, %92, %cst_18 {dimension_numbers = #tpu.dot_dimension_numbers<[1], [0], [0], [1], [0, 0, 1, 1], [], []>} : vector<16x32xf32>, vector<32x32xf32>, vector<16x32xf32> -> vector<16x32xf32>
    %94 = arith.addf %0, %93 : vector<16x32xf32>
    %95 = vector.broadcast %7 : vector<1x32xf32> to vector<16x32xf32>
    %96 = arith.addf %94, %95 : vector<16x32xf32>
    %cst_19 = arith.constant dense<0.000000e+00> : vector<16xf32>
    %97 = vector.multi_reduction <add>, %96, %cst_19 [1] : vector<16x32xf32> to vector<16xf32>
    %98 = vector.shape_cast %97 : vector<16xf32> to vector<16x1xf32>
    %cst_20 = arith.constant 3.200000e+01 : f32
    %99 = vector.broadcast %cst_20 : f32 to vector<16x1xf32>
    %100 = arith.divf %98, %99 : vector<16x1xf32>
    %101 = vector.broadcast %100 : vector<16x1xf32> to vector<16x32xf32>
    %102 = arith.subf %96, %101 : vector<16x32xf32>
    %103 = arith.mulf %102, %102 : vector<16x32xf32>
    %cst_21 = arith.constant dense<0.000000e+00> : vector<16xf32>
    %104 = vector.multi_reduction <add>, %103, %cst_21 [1] : vector<16x32xf32> to vector<16xf32>
    %105 = vector.shape_cast %104 : vector<16xf32> to vector<16x1xf32>
    %cst_22 = arith.constant 0.0322580636 : f32
    %106 = vector.broadcast %cst_22 : f32 to vector<16x1xf32>
    %107 = arith.mulf %105, %106 : vector<16x1xf32>
    %108 = math.sqrt %107 : vector<16x1xf32>
    %cst_23 = arith.constant 9.99999997E-7 : f32
    %109 = vector.broadcast %cst_23 : f32 to vector<16x1xf32>
    %110 = arith.addf %108, %109 : vector<16x1xf32>
    %111 = tpu.reciprocal %110 : vector<16x1xf32> -> vector<16x1xf32>
    %112 = vector.broadcast %100 : vector<16x1xf32> to vector<16x32xf32>
    %113 = arith.subf %96, %112 : vector<16x32xf32>
    %114 = vector.broadcast %5 : vector<1x32xf32> to vector<16x32xf32>
    %115 = vector.broadcast %111 : vector<16x1xf32> to vector<16x32xf32>
    %116 = arith.mulf %114, %115 : vector<16x32xf32>
    %117 = arith.mulf %113, %116 : vector<16x32xf32>
    %118 = vector.broadcast %6 : vector<1x32xf32> to vector<16x32xf32>
    %119 = arith.addf %117, %118 : vector<16x32xf32>
    %c0_24 = arith.constant 0 : index
    %c0_25 = arith.constant 0 : index
    %120 = vector.load %arg4[%c0_24, %c0_25] : memref<32x64xf32, #tpu.memory_space<vmem>>, vector<32x64xf32>
    %cst_26 = arith.constant dense<0.000000e+00> : vector<16x64xf32>
    %121 = tpu.matmul %119, %120, %cst_26 {dimension_numbers = #tpu.dot_dimension_numbers<[1], [0], [0], [1], [0, 0, 1, 1], [], []>} : vector<16x32xf32>, vector<32x64xf32>, vector<16x64xf32> -> vector<16x64xf32>
    %122 = vector.broadcast %9 : vector<1x64xf32> to vector<16x64xf32>
    %123 = arith.addf %121, %122 : vector<16x64xf32>
    %cst_27 = arith.constant 0.000000e+00 : f32
    %124 = vector.broadcast %cst_27 : f32 to vector<16x64xf32>
    %125 = arith.maximumf %123, %124 : vector<16x64xf32>
    %c0_28 = arith.constant 0 : index
    %c0_29 = arith.constant 0 : index
    %126 = vector.load %arg5[%c0_28, %c0_29] : memref<64x32xf32, #tpu.memory_space<vmem>>, vector<64x32xf32>
    %cst_30 = arith.constant dense<0.000000e+00> : vector<16x32xf32>
    %127 = tpu.matmul %125, %126, %cst_30 {dimension_numbers = #tpu.dot_dimension_numbers<[1], [0], [0], [1], [0, 0, 1, 1], [], []>} : vector<16x64xf32>, vector<64x32xf32>, vector<16x32xf32> -> vector<16x32xf32>
    %128 = vector.broadcast %8 : vector<1x32xf32> to vector<16x32xf32>
    %129 = arith.addf %127, %128 : vector<16x32xf32>
    %130 = arith.addf %96, %129 : vector<16x32xf32>
    %c0_31 = arith.constant 0 : index
    %c0_32 = arith.constant 0 : index
    %131 = vector.load %arg7[%c0_31, %c0_32] : memref<16x32xf32, #tpu.memory_space<vmem>>, vector<16x32xf32>
    tpu.vector_store %arg7[%c0_31, %c0_32], %130 {strides = array<i32>} : memref<16x32xf32, #tpu.memory_space<vmem>>, vector<16x32xf32>,
    return
  }
}

</mosaic_0001>

<bundles_post_ra>
// kernel: decoder_layer.1
= control target key start
LH: loop header
LB: loop body
LE: loop exit
PB: predicated region body
PF: predicated region fallthrough
CT: control target
= control target key end

     0   :  { %12 = vsyncpa [#allocation3], 0  ;;  %s2679_s0 = inlined_call_operand.hbm [shape: f32[16,32], index: 0, kind: input, shape index: {}]   ;;  %s2680_s1 = inlined_call_operand.hbm [shape: f32[8,8], index: 1, kind: input, shape index: {}]   ;;  %s2681_s2 = inlined_call_operand.vmem [shape: f32[32,96], index: 2, kind: input, shape index: {}]   ;;  %s2682_s3 = inlined_call_operand.vmem [shape: f32[32,32], index: 3, kind: input, shape index: {}]   ;;  %s2683_s4 = inlined_call_operand.vmem [shape: f32[32,64], index: 4, kind: input, shape index: {}]   ;;  %s2684_s5 = inlined_call_operand.vmem [shape: f32[64,32], index: 5, kind: input, shape index: {}]   ;;  %s2685_s6 = inlined_call_operand.vmem [shape: f32[8,96], index: 6, kind: input, shape index: {}]   ;;  %s2686_s7 = inlined_call_operand.hbm [shape: f32[16,32], index: 7, kind: output, shape index: {}]  }
   0x1   :  { %13 = vsyncpa [#allocation6], 0 }
   0x2   :  { %14 = vsyncpa [#allocation4], 0  ;;  %s2301_s24 = smov [#allocation2]   ;;  %s2229_s28 = scalar_lea.hbm %s2679_s0, 256 }
   0x3   :  { %s20_s25 = sshll.u32 %s2301_s24, 4  ;;  %p2230_p0 = scmp.ne.s32.totalorder %s2679_s0, %s2229_s28  ;;  %s21_s25 = int_to_ptr.vmem [resolvable:$true] %s20_s25 }
   0x4   :  { %p2233_p1 = scmp.lt.u32.totalorder %s2229_s28, %s2679_s0 }
   0x6   :  { %p2235_p2 = pnand %p2233_p1, %p2230_p0 }
   0x8   :  { %2238 = shalt.err (!%p2235_p2)
}
   0x9   :  { %s2239_s10 = scalar_lea.vmem %s21_s25, 256  ;;  %p2244_p4 = scmp.lt.s32.totalorder %s21_s25, %s21_s25 }
   0xa   :  { %p2240_p3 = scmp.ne.s32.totalorder %s21_s25, %s2239_s10  ;;  %p2245_p5 = scmp.lt.s32.totalorder %s2239_s10, %s2239_s10 }
   0xc   :  { %p2246_p6 = por %p2245_p5, %p2244_p4 }
   0xe   :  { %p2247_p7 = pnand %p2246_p6, %p2240_p3 }
  0x10   :  { %2250 = shalt.err (!%p2247_p7)
}
  0x11   :  { %s2302_s11 = smov 128   ;;  %s2303_s12 = smov 8  }
  0x12   :  { %26 = dma.hbm_to_vmem [thread:$0]  %s2679_s0, 256, %s21_s25, [#allocation3], %s2302_s11, %s2302_s11, %s2303_s12  }
  0x13   :  { %s2304_s15 = smov [#allocation5]   ;;  %s2251_s19 = scalar_lea.hbm %s2680_s1, 128 }
  0x14   :  { %s33_s16 = sshll.u32 %s2304_s15, 4  ;;  %p2252_p8 = scmp.ne.s32.totalorder %s2680_s1, %s2251_s19  ;;  %s34_s16 = int_to_ptr.vmem [resolvable:$true] %s33_s16 }
  0x15   :  { %p2255_p9 = scmp.lt.u32.totalorder %s2251_s19, %s2680_s1 }
  0x17   :  { %p2257_p10 = pnand %p2255_p9, %p2252_p8 }
  0x19   :  { %2260 = shalt.err (!%p2257_p10)
}
  0x1a   :  { %s2261_s24 = scalar_lea.vmem %s34_s16, 128  ;;  %p2266_p12 = scmp.lt.s32.totalorder %s34_s16, %s34_s16 }
  0x1b   :  { %p2262_p11 = scmp.ne.s32.totalorder %s34_s16, %s2261_s24  ;;  %p2267_p13 = scmp.lt.s32.totalorder %s2261_s24, %s2261_s24 }
  0x1d   :  { %p2268_p0 = por %p2267_p13, %p2266_p12 }
  0x1f   :  { %p2269_p1 = pnand %p2268_p0, %p2262_p11 }
  0x21   :  { %2272 = shalt.err (!%p2269_p1)
}
  0x22   :  { %36 = dma.hbm_to_vmem [thread:$0]  %s2680_s1, 128, %s34_s16, [#allocation6]  }
  0x23   :  { %2295 = dma.done.wait [#allocation3], 256  }
  0x24   :  { %2296 = vsyncadd [#allocation3], 4294967040 }
  0x25   :  { %2297 = dma.done.wait [#allocation6], 128  }
  0x26   :  { %2298 = vsyncadd [#allocation6], 4294967168  ;;  %vm57_vm0 = vcmask 261120   ;;  %v2382_v0 = vld [vmem:[#allocation2] sm:$0xff]  ;;  %v2384_v1 = vld [vmem:[#allocation2 + $0x8] sm:$0xff]  ;;  %v97_v27 = vlaneseq  ;;  %v2305_v52 = vmov 0.0  }
  0x27   :  { %v58_v2 = vsel %vm57_vm0, %v2382_v0, 0.0  ;;  %v61_v3 = vsel %vm57_vm0, %v2384_v1, 0.0  ;;  %v111_v14 = vld [vmem:[%s2681_s2] sm:$0xff]  ;;  %v112_v15 = vld [vmem:[%s2681_s2 + $0x8] sm:$0xff]  ;;  %v113_v16 = vld [vmem:[%s2681_s2 + $0x10] sm:$0xff]  ;;  %2016 = vmatprep.subr.mxu0 %v2305_v52  ;;  %vm2306_vm5 = vmmov 0  }
  0x28   :  { %59 = vadd.xlane.f32.xlu0 %v58_v2  ;;  %v2127_v17 = vpack.c.bf16 %v112_v15, %v111_v14  ;;  %v114_v18 = vld [vmem:[%s2681_s2 + $0x18] sm:$0xff]  ;;  %v2406_v34 = vshrl.u32 %v97_v27, 7  ;;  %v2412_v39 = vld [vmem:[%s2685_s6] sm:$0xff]  ;;  %2018 = vmatprep.mubr.msk.f32.mxu0 %vm2306_vm5, %v2305_v52  ;;  %s2307_s6 = smov 80   ;;  %s2308_s13 = smov 104   ;;  %vm216_vm6 = vcmask 64512  }
  0x29   :  { %v2131_v19 = vpack.c.bf16 %v114_v18, %v113_v16  ;;  %s2309_s14 = smov 56   ;;  %s2310_s15 = smov 120   ;;  %vm1532_vm7 = vcmask 130048   ;;  %vm1534_vm8 = vcmask 195584   ;;  %vm1799_vm13 = vcmask 523264  }
  0x2a   :  { %2128 = vmatprep.subr.bf16.mxu1 %v2127_v17  ;;  %v99_v38 = vsub.s32 0, %v2406_v34  ;;  %v107_v41 = vsub.s32 1, %v2406_v34  ;;  %v117_v51 = vsub.s32 7, %v2406_v34  ;;  %s2311_s16 = smov 112   ;;  %s2312_s0 = smov 16  }
  0x2b   :  { %2130 = vmatpush3.bf16.msra.mxu1 %v2127_v17  ;;  %s2313_s25 = smov 24  }
  0x2c   :  { %62 = vadd.xlane.f32.xlu0 %v61_v3  ;;  %2132 = vmatprep.subr.bf16.mxu1 %v2131_v19  ;;  %v100_v40 = vrot.slane %v2412_v39, %v99_v38  ;;  %v108_v44 = vrot.slane %v2412_v39, %v107_v41  ;;  %v118_v53 = vrot.slane %v2412_v39, %v117_v51 }
  0x2f   :  { %2134 = vmatpush3.bf16.msra.mxu1 %v2131_v19 }
  0x30   :  { %2006 = vmatprep.subr.mxu1 %v2305_v52 }
  0xb5   :  { %v60_v4 = vpop.xlane.xlu0 %59 }
  0xb6   :  { %v65_v5 = vmul.f32 0.03125, %v60_v4 }
  0xb8   :  { %v67_v6 = vsub.f32 %v2382_v0, %v65_v5 }
  0xb9   :  { %v63_v7 = vpop.xlane.xlu0 %62 }
  0xba   :  { %v66_v8 = vmul.f32 0.03125, %v63_v7  ;;  %v69_v9 = vmul.f32 %v67_v6, %v67_v6 }
  0xbc   :  { %v68_v10 = vsub.f32 %v2384_v1, %v66_v8  ;;  %v71_v11 = vsel %vm57_vm0, %v69_v9, 0.0 }
  0xbd   :  { %72 = vadd.xlane.f32.xlu1 %v71_v11 }
  0xbe   :  { %v70_v12 = vmul.f32 %v68_v10, %v68_v10 }
  0xc0   :  { %v74_v13 = vsel %vm57_vm0, %v70_v12, 0.0 }
  0xc1   :  { %75 = vadd.xlane.f32.xlu1 %v74_v13 }
 0x14a   :  { %v73_v20 = vpop.xlane.xlu1 %72 }
 0x14b   :  { %v77_v21 = vmul.f32 0.032258064, %v73_v20 }
 0x14d   :  { %2181 = vrsqrt.f32 %v77_v21  ;;  %vm81_vm1 = vcmp.eq.f32.partialorder %v77_v21, inf  ;;  %v84_v26 = vand.u32 2147483648, %v77_v21  ;;  %vm83_vm2 = vcmp.eq.f32.partialorder %v77_v21, 0.0 }
 0x14e   :  { %v76_v22 = vpop.xlane.xlu1 %75 }
 0x14f   :  { %v78_v23 = vmul.f32 0.032258064, %v76_v22 }
 0x151   :  { %2183 = vrsqrt.f32 %v78_v23  ;;  %vm88_vm3 = vcmp.eq.f32.partialorder %v78_v23, inf  ;;  %v91_v33 = vand.u32 2147483648, %v78_v23  ;;  %vm90_vm4 = vcmp.eq.f32.partialorder %v78_v23, 0.0 }
 0x157   :  { %v2182_v24 = vpop.eup %2181 }
 0x158   :  { %v80_v25 = vmul.f32 %v2182_v24, %v77_v21 }
 0x15a   :  { %v82_v28 = vsel %vm81_vm1, %v77_v21, %v80_v25 }
 0x15b   :  { %v2184_v29 = vpop.eup %2183  ;;  %v85_v30 = vsel %vm83_vm2, %v84_v26, %v82_v28 }
 0x15c   :  { %v87_v31 = vmul.f32 %v2184_v29, %v78_v23  ;;  %v93_v32 = vadd.f32 1e-06, %v85_v30 }
 0x15e   :  { %v89_v35 = vsel %vm88_vm3, %v78_v23, %v87_v31  ;;  %2185 = vrcp.f32 %v93_v32 }
 0x15f   :  { %v92_v36 = vsel %vm90_vm4, %v91_v33, %v89_v35 }
 0x160   :  { %v94_v37 = vadd.f32 1e-06, %v92_v36 }
 0x162   :  { %2187 = vrcp.f32 %v94_v37 }
 0x168   :  { %v2186_v42 = vpop.eup %2185 }
 0x169   :  { %v101_v43 = vmul.f32 %v2186_v42, %v100_v40 }
 0x16b   :  { %v103_v45 = vmul.f32 %v101_v43, %v67_v6 }
 0x16c   :  { %v2188_v46 = vpop.eup %2187 }
 0x16d   :  { %v102_v47 = vmul.f32 %v2188_v46, %v100_v40  ;;  %v109_v48 = vadd.f32 %v108_v44, %v103_v45 }
 0x16f   :  { %v104_v49 = vmul.f32 %v102_v47, %v68_v10  ;;  %2003 = vmatprep.mubr.msk.f32.mxu1 %vm57_vm0, %v109_v48  ;;  %v55_v10 = vld [vmem:[#allocation5] sm:$0xff] }
 0x171   :  { %v110_v50 = vadd.f32 %v108_v44, %v104_v49 }
 0x173   :  { %2004 = vmatmul.mubr.msk.f32.vlgmr.msra.gmra.mrb[0].mxu1 %vm57_vm0, %v110_v50 }
 0x174   :  { %2008 = vmatprep.mubr.msk.f32.mxu1 %vm2306_vm5, %v2305_v52 }
 0x246   :  { %v2005_v54 = vpop.f32.mrb[0].mxu1 }
 0x247   :  { %v191_v55 = vpop.f32.mrb[1].mxu1  ;;  %v2431_v57 = vadd.f32 %v2005_v54, %v118_v53 }
 0x248   :  { %v2427_v56 = vadd.f32 %v191_v55, %v118_v53 }
 0x24a   :  { %203 = vrot.lane.b32.xlu1 %v2427_v56, %s2307_s6  ;;  %201 = vrot.lane.b32.xlu0 %v2427_v56, %s2308_s13 }
 0x24e   :  { %205 = vrot.lane.b32.xlu1 %v2427_v56, %s2309_s14  ;;  %210 = vrot.lane.b32.xlu0 %v2431_v57, %s2307_s6 }
 0x252   :  { %208 = vrot.lane.b32.xlu1 %v2431_v57, %s2308_s13  ;;  %214 = vrot.lane.b32.xlu0 %v2427_v56, %s2310_s15 }
 0x256   :  { %212 = vrot.lane.b32.xlu1 %v2431_v57, %s2309_s14 }
 0x2bc   :  { %v2438_v58 = vpop.permute.xlu1 %203  ;;  %v2440_v59 = vpop.permute.xlu0 %201 }
 0x2bd   :  { %367 = vrot.lane.b32.xlu0 %v2438_v58, %s2310_s15  ;;  %291 = vrot.lane.b32.xlu1 %v2440_v59, %s2310_s15 }
 0x2c0   :  { %v2444_v60 = vpop.permute.xlu1 %205  ;;  %v2446_v61 = vpop.permute.xlu0 %210 }
 0x2c1   :  { %519 = vrot.lane.b32.xlu0 %v2431_v57, %s2310_s15  ;;  %443 = vrot.lane.b32.xlu1 %v2444_v60, %s2310_s15 }
 0x2c4   :  { %v2450_v62 = vpop.permute.xlu1 %208  ;;  %v215_v63 = vpop.permute.xlu0 %214 }
 0x2c5   :  { %595 = vrot.lane.b32.xlu1 %v2450_v62, %s2310_s15  ;;  %671 = vrot.lane.b32.xlu0 %v2446_v61, %s2310_s15 }
 0x2c6   :  { %2007 = vmatpush3.xpose.msk.msra.mxu1 %vm216_vm6, %v215_v63 }
 0x2c7   :  { %2011 = vmatprep.subr.mxu1 %v2305_v52 }
 0x2c8   :  { %v2456_v2 = vpop.permute.xlu1 %212 }
 0x2c9   :  { %2009 = vmatmul.mubr.msk.f32.vlgmr.msra.gmra.mrb[2].mxu1 %vm216_vm6, %v2427_v56  ;;  %747 = vrot.lane.b32.xlu1 %v2456_v2, %s2310_s15 }
 0x2ca   :  { %2013 = vmatprep.mubr.msk.f32.mxu1 %vm2306_vm5, %v2305_v52 }
 0x32f   :  { %v292_v3 = vpop.permute.xlu1 %291  ;;  %v368_v4 = vpop.permute.xlu0 %367 }
 0x330   :  { %2012 = vmatpush3.xpose.msk.msra.mxu1 %vm216_vm6, %v292_v3  ;;  %2017 = vmatpush3.xpose.msk.msra.mxu0 %vm216_vm6, %v368_v4 }
 0x331   :  { %2021 = vmatprep.subr.mxu1 %v2305_v52  ;;  %2026 = vmatprep.subr.mxu0 %v2305_v52 }
 0x333   :  { %v444_v5 = vpop.permute.xlu1 %443  ;;  %2014 = vmatmul.mubr.msk.f32.vlgmr.msra.gmra.mrb[4].mxu1 %vm216_vm6, %v2440_v59  ;;  %2019 = vmatmul.mubr.msk.f32.vlgmr.msra.gmra.mrb[0].mxu0 %vm216_vm6, %v2438_v58  ;;  %v520_v6 = vpop.permute.xlu0 %519 }
 0x334   :  { %2022 = vmatpush3.xpose.msk.msra.mxu1 %vm216_vm6, %v444_v5  ;;  %2027 = vmatpush3.xpose.msk.msra.mxu0 %vm216_vm6, %v520_v6 }
 0x335   :  { %2023 = vmatprep.mubr.msk.f32.mxu1 %vm2306_vm5, %v2305_v52  ;;  %2028 = vmatprep.mubr.msk.f32.mxu0 %vm2306_vm5, %v2305_v52 }
 0x336   :  { %2031 = vmatprep.subr.mxu1 %v2305_v52  ;;  %2036 = vmatprep.subr.mxu0 %v2305_v52 }
 0x337   :  { %v596_v7 = vpop.permute.xlu1 %595  ;;  %2024 = vmatmul.mubr.msk.f32.vlgmr.msra.gmra.mrb[6].mxu1 %vm216_vm6, %v2444_v60  ;;  %2029 = vmatmul.mubr.msk.f32.vlgmr.msra.gmra.mrb[2].mxu0 %vm216_vm6, %v2431_v57  ;;  %v672_v8 = vpop.permute.xlu0 %671 }
 0x338   :  { %2032 = vmatpush3.xpose.msk.msra.mxu1 %vm216_vm6, %v596_v7  ;;  %2037 = vmatpush3.xpose.msk.msra.mxu0 %vm216_vm6, %v672_v8 }
 0x339   :  { %2033 = vmatprep.mubr.msk.f32.mxu1 %vm2306_vm5, %v2305_v52  ;;  %2038 = vmatprep.mubr.msk.f32.mxu0 %vm2306_vm5, %v2305_v52 }
 0x33a   :  { %2041 = vmatprep.subr.mxu1 %v2305_v52  ;;  %2046 = vmatprep.subr.mxu0 %v2305_v52 }
 0x33b   :  { %v748_v9 = vpop.permute.xlu1 %747  ;;  %2034 = vmatmul.mubr.msk.f32.vlgmr.msra.gmra.mrb[8].mxu1 %vm216_vm6, %v2450_v62  ;;  %2039 = vmatmul.mubr.msk.f32.vlgmr.msra.gmra.mrb[4].mxu0 %vm216_vm6, %v2446_v61 }
 0x33c   :  { %2042 = vmatpush3.xpose.msk.msra.mxu1 %vm216_vm6, %v748_v9  ;;  %2043 = vmatprep.mubr.msk.f32.mxu1 %vm2306_vm5, %v2305_v52 }
 0x33d   :  { %2051 = vmatprep.subr.mxu1 %v2305_v52  ;;  %2048 = vmatprep.mubr.msk.f32.mxu0 %vm2306_vm5, %v2305_v52 }
 0x33f   :  { %2044 = vmatmul.mubr.msk.f32.vlgmr.msra.gmra.mrb[10].mxu1 %vm216_vm6, %v2456_v2 }
 0x340   :  { %2053 = vmatprep.mubr.msk.f32.mxu1 %vm2306_vm5, %v2305_v52 }
 0x39c   :  { %v287_v11 = vpop.f32.mrb[2].mxu1 }
 0x39d   :  { %v288_v12 = vadd.f32 %v287_v11, %v55_v10  ;;  %v2010_v13 = vpop.f32.mrb[3].mxu1 }
 0x39f   :  { %v823_v14 = vsel %vm216_vm6, %v288_v12, -inf }
 0x3a0   :  { %824 = vmax.xlane.f32.xlu0 %v823_v14 }
 0x406   :  { %v363_v15 = vpop.f32.mrb[4].mxu1  ;;  %v439_v16 = vpop.f32.mrb[0].mxu0 }
 0x407   :  { %v364_v17 = vadd.f32 %v363_v15, %v55_v10  ;;  %v440_v18 = vadd.f32 %v439_v16, %v55_v10  ;;  %v2015_v19 = vpop.f32.mrb[5].mxu1  ;;  %v2020_v20 = vpop.f32.mrb[1].mxu0 }
 0x409   :  { %v826_v21 = vsel %vm216_vm6, %v364_v17, -inf  ;;  %v829_v22 = vsel %vm216_vm6, %v440_v18, -inf }
 0x40a   :  { %827 = vmax.xlane.f32.xlu1 %v826_v21  ;;  %v515_v23 = vpop.f32.mrb[6].mxu1  ;;  %830 = vmax.xlane.f32.xlu0 %v829_v22  ;;  %v591_v24 = vpop.f32.mrb[2].mxu0 }
 0x40b   :  { %v516_v25 = vadd.f32 %v515_v23, %v55_v10  ;;  %v2025_v26 = vpop.f32.mrb[7].mxu1  ;;  %v2030_v27 = vpop.f32.mrb[3].mxu0  ;;  %v592_v28 = vadd.f32 %v591_v24, %v55_v10 }
 0x40d   :  { %v832_v29 = vsel %vm216_vm6, %v516_v25, -inf  ;;  %v835_v38 = vsel %vm216_vm6, %v592_v28, -inf }
 0x40e   :  { %v667_v30 = vpop.f32.mrb[8].mxu1  ;;  %833 = vmax.xlane.f32.xlu0 %v832_v29  ;;  %v743_v31 = vpop.f32.mrb[4].mxu0 }
 0x40f   :  { %v668_v32 = vadd.f32 %v667_v30, %v55_v10  ;;  %v2035_v33 = vpop.f32.mrb[9].mxu1  ;;  %v2040_v35 = vpop.f32.mrb[5].mxu0  ;;  %v744_v36 = vadd.f32 %v743_v31, %v55_v10 }
 0x411   :  { %v838_v37 = vsel %vm216_vm6, %v668_v32, -inf  ;;  %v841_v44 = vsel %vm216_vm6, %v744_v36, -inf }
 0x412   :  { %839 = vmax.xlane.f32.xlu1 %v838_v37  ;;  %v819_v40 = vpop.f32.mrb[10].mxu1  ;;  %836 = vmax.xlane.f32.xlu0 %v835_v38 }
 0x413   :  { %v820_v41 = vadd.f32 %v819_v40, %v55_v10  ;;  %v2045_v42 = vpop.f32.mrb[11].mxu1 }
 0x415   :  { %v844_v43 = vsel %vm216_vm6, %v820_v41, -inf }
 0x416   :  { %845 = vmax.xlane.f32.xlu1 %v844_v43  ;;  %842 = vmax.xlane.f32.xlu0 %v841_v44 }
 0x427   :  { %987 = vrot.lane.b32.xlu1 %v2440_v59, %s2311_s16 }
 0x42b   :  { %1063 = vrot.lane.b32.xlu1 %v2438_v58, %s2311_s16 }
 0x42c   :  { %911 = vrot.lane.b32.xlu0 %v2427_v56, %s2311_s16 }
 0x42d   :  { %v825_v45 = vpop.xlane.xlu0 %824 }
 0x42e   :  { %v847_v46 = vsub.f32 %v288_v12, %v825_v45 }
 0x42f   :  { %1139 = vrot.lane.b32.xlu1 %v2444_v60, %s2311_s16 }
 0x430   :  { %1215 = vrot.lane.b32.xlu0 %v2431_v57, %s2311_s16  ;;  %v855_v47 = vmul.f32 1.442695, %v847_v46 }
 0x432   :  { %2189 = vpow2.f32 %v855_v47 }
 0x433   :  { %1291 = vrot.lane.b32.xlu1 %v2450_v62, %s2311_s16 }
 0x43c   :  { %v2525_v48 = vpop.eup %2189 }
 0x43d   :  { %v871_v49 = vsel %vm216_vm6, %v2525_v48, 0.0 }
 0x44f   :  { %872 = vadd.xlane.f32.xlu0 %v871_v49 }
 0x497   :  { %v828_v50 = vpop.xlane.xlu1 %827  ;;  %v831_v51 = vpop.xlane.xlu0 %830 }
 0x498   :  { %v848_v53 = vsub.f32 %v364_v17, %v828_v50  ;;  %v849_v54 = vsub.f32 %v440_v18, %v831_v51 }
 0x49a   :  { %v857_v55 = vmul.f32 1.442695, %v848_v53  ;;  %v859_v56 = vmul.f32 1.442695, %v849_v54 }
 0x49b   :  { %v834_v57 = vpop.xlane.xlu0 %833 }
 0x49c   :  { %2191 = vpow2.f32 %v857_v55  ;;  %v850_v58 = vsub.f32 %v516_v25, %v834_v57 }
 0x49d   :  { %2193 = vpow2.f32 %v859_v56 }
 0x49e   :  { %v861_v59 = vmul.f32 1.442695, %v850_v58 }
 0x49f   :  { %v840_v60 = vpop.xlane.xlu1 %839  ;;  %v837_v62 = vpop.xlane.xlu0 %836 }
 0x4a0   :  { %2195 = vpow2.f32 %v861_v59  ;;  %v852_v63 = vsub.f32 %v668_v32, %v840_v60  ;;  %v851_v3 = vsub.f32 %v592_v28, %v837_v62  ;;  %v1551_v62 = vld [vmem:[%s2682_s3] sm:$0xff] }
 0x4a2   :  { %v865_v4 = vmul.f32 1.442695, %v852_v63  ;;  %v863_v5 = vmul.f32 1.442695, %v851_v3  ;;  %v1552_v63 = vld [vmem:[%s2682_s3 + $0x8] sm:$0xff] }
 0x4a3   :  { %v846_v6 = vpop.xlane.xlu1 %845  ;;  %v843_v7 = vpop.xlane.xlu0 %842  ;;  %v2135_v3 = vpack.c.bf16 %v1552_v63, %v1551_v62  ;;  %v1790_v62 = vld [vmem:[%s2684_s5 + $0x18] sm:$0xff] }
 0x4a4   :  { %2197 = vpow2.f32 %v865_v4  ;;  %v854_v8 = vsub.f32 %v820_v41, %v846_v6  ;;  %v853_v9 = vsub.f32 %v744_v36, %v843_v7  ;;  %v1554_v4 = vld [vmem:[%s2682_s3 + $0x18] sm:$0xff] }
 0x4a5   :  { %2199 = vpow2.f32 %v863_v5 }
 0x4a6   :  { %v2192_v10 = vpop.eup %2191  ;;  %v869_v11 = vmul.f32 1.442695, %v854_v8  ;;  %v867_v12 = vmul.f32 1.442695, %v853_v9 }
 0x4a7   :  { %v2194_v13 = vpop.eup %2193  ;;  %v988_v14 = vpop.permute.xlu1 %987  ;;  %v874_v16 = vsel %vm216_vm6, %v2192_v10, 0.0 }
 0x4a8   :  { %v912_v15 = vpop.permute.xlu0 %911  ;;  %2201 = vpow2.f32 %v869_v11  ;;  %875 = vadd.xlane.f32.xlu1 %v874_v16  ;;  %2052 = vmatpush3.msra.mxu1 %v988_v14  ;;  %v877_v17 = vsel %vm216_vm6, %v2194_v13, 0.0 }
 0x4a9   :  { %2203 = vpow2.f32 %v867_v12  ;;  %878 = vadd.xlane.f32.xlu0 %v877_v17  ;;  %2047 = vmatpush3.msra.mxu0 %v912_v15 }
 0x4aa   :  { %v2196_v18 = vpop.eup %2195  ;;  %2056 = vmatprep.subr.mxu0 %v2305_v52  ;;  %2061 = vmatprep.subr.mxu1 %v2305_v52 }
 0x4ab   :  { %v880_v19 = vsel %vm216_vm6, %v2196_v18, 0.0  ;;  %v1064_v32 = vpop.permute.xlu1 %1063 }
 0x4ac   :  { %881 = vadd.xlane.f32.xlu1 %v880_v19  ;;  %v1216_v28 = vpop.permute.xlu0 %1215 }
 0x4ae   :  { %v2198_v20 = vpop.eup %2197 }
 0x4af   :  { %v2200_v21 = vpop.eup %2199  ;;  %v886_v22 = vsel %vm216_vm6, %v2198_v20, 0.0  ;;  %v1140_v33 = vpop.permute.xlu1 %1139 }
 0x4b0   :  { %887 = vadd.xlane.f32.xlu1 %v886_v22  ;;  %v883_v23 = vsel %vm216_vm6, %v2200_v21, 0.0 }
 0x4b1   :  { %884 = vadd.xlane.f32.xlu0 %v883_v23 }
 0x4b2   :  { %v2536_v24 = vpop.eup %2201 }
 0x4b3   :  { %v2538_v25 = vpop.eup %2203  ;;  %v892_v26 = vsel %vm216_vm6, %v2536_v24, 0.0 }
 0x4b4   :  { %893 = vadd.xlane.f32.xlu1 %v892_v26  ;;  %v889_v27 = vsel %vm216_vm6, %v2538_v25, 0.0 }
 0x4b5   :  { %890 = vadd.xlane.f32.xlu0 %v889_v27 }
 0x4c5   :  { %1443 = vrot.lane.b32.xlu1 %v2456_v2, %s2311_s16  ;;  %v1292_v2 = vpop.permute.xlu1 %1291 }
 0x4cb   :  { %1367 = vrot.lane.b32.xlu0 %v2446_v61, %s2311_s16 }
 0x4dc   :  { %v873_v29 = vpop.xlane.xlu0 %872 }
 0x4dd   :  { %2205 = vrcp.f32 %v873_v29 }
 0x4e7   :  { %v2206_v30 = vpop.eup %2205 }
 0x4e8   :  { %v903_v31 = vmul.f32 %v2206_v30, %v2525_v48 }
 0x4ea   :  { %2049 = vmatmul.mubr.msk.f32.vlgmr.msra.gmra.mrb[6].mxu0 %vm216_vm6, %v903_v31 }
 0x4eb   :  { %2057 = vmatpush3.msra.mxu0 %v1064_v32  ;;  %2058 = vmatprep.mubr.msk.f32.mxu0 %vm2306_vm5, %v2305_v52  ;;  %v1640_v32 = vsub.s32 4, %v2406_v34 }
 0x4ec   :  { %2066 = vmatprep.subr.mxu0 %v2305_v52 }
 0x535   :  { %v876_v35 = vpop.xlane.xlu1 %875 }
 0x536   :  { %2207 = vrcp.f32 %v876_v35  ;;  %v879_v61 = vpop.xlane.xlu0 %878 }
 0x537   :  { %2209 = vrcp.f32 %v879_v61 }
 0x539   :  { %v882_v36 = vpop.xlane.xlu1 %881 }
 0x53a   :  { %2211 = vrcp.f32 %v882_v36 }
 0x53d   :  { %v888_v37 = vpop.xlane.xlu1 %887 }
 0x53e   :  { %2213 = vrcp.f32 %v888_v37  ;;  %v885_v38 = vpop.xlane.xlu0 %884 }
 0x53f   :  { %2215 = vrcp.f32 %v885_v38 }
 0x540   :  { %v2208_v40 = vpop.eup %2207 }
 0x541   :  { %v2210_v41 = vpop.eup %2209  ;;  %v904_v42 = vmul.f32 %v2208_v40, %v2192_v10  ;;  %v894_v43 = vpop.xlane.xlu1 %893 }
 0x542   :  { %v905_v44 = vmul.f32 %v2210_v41, %v2194_v13  ;;  %2217 = vrcp.f32 %v894_v43  ;;  %v891_v45 = vpop.xlane.xlu0 %890 }
 0x543   :  { %2219 = vrcp.f32 %v891_v45  ;;  %2054 = vmatmul.mubr.msk.f32.vlgmr.msra.gmra.mrb[12].mxu1 %vm216_vm6, %v904_v42 }
 0x544   :  { %v2212_v46 = vpop.eup %2211  ;;  %2059 = vmatmul.mubr.msk.f32.vlgmr.msra.gmra.mrb[8].mxu0 %vm216_vm6, %v905_v44  ;;  %2062 = vmatpush3.msra.mxu1 %v1140_v33  ;;  %v1641_v33 = vrot.slane %v2412_v39, %v1640_v32 }
 0x545   :  { %v906_v47 = vmul.f32 %v2212_v46, %v2196_v18  ;;  %2067 = vmatpush3.msra.mxu0 %v1216_v28  ;;  %2063 = vmatprep.mubr.msk.f32.mxu1 %vm2306_vm5, %v2305_v52  ;;  %v1444_v53 = vpop.permute.xlu1 %1443 }
 0x546   :  { %2071 = vmatprep.subr.mxu1 %v2305_v52  ;;  %2068 = vmatprep.mubr.msk.f32.mxu0 %vm2306_vm5, %v2305_v52  ;;  %v1368_v55 = vpop.permute.xlu0 %1367 }
 0x547   :  { %2064 = vmatmul.mubr.msk.f32.vlgmr.msra.gmra.mrb[14].mxu1 %vm216_vm6, %v906_v47  ;;  %2076 = vmatprep.subr.mxu0 %v2305_v52 }
 0x548   :  { %v2214_v48 = vpop.eup %2213  ;;  %2072 = vmatpush3.msra.mxu1 %v1292_v2  ;;  %2073 = vmatprep.mubr.msk.f32.mxu1 %vm2306_vm5, %v2305_v52 }
 0x549   :  { %v2216_v49 = vpop.eup %2215  ;;  %v908_v50 = vmul.f32 %v2214_v48, %v2198_v20  ;;  %2081 = vmatprep.subr.mxu1 %v2305_v52 }
 0x54a   :  { %v907_v51 = vmul.f32 %v2216_v49, %v2200_v21 }
 0x54b   :  { %2074 = vmatmul.mubr.msk.f32.vlgmr.msra.gmra.mrb[16].mxu1 %vm216_vm6, %v908_v50  ;;  %v1696_v50 = vld [vmem:[%s2683_s4] sm:$0xff] }
 0x54c   :  { %v2218_v54 = vpop.eup %2217  ;;  %2069 = vmatmul.mubr.msk.f32.vlgmr.msra.gmra.mrb[10].mxu0 %vm216_vm6, %v907_v51  ;;  %2082 = vmatpush3.msra.mxu1 %v1444_v53  ;;  %v1697_v51 = vld [vmem:[%s2683_s4 + $0x8] sm:$0xff]  ;;  %v1698_v53 = vld [vmem:[%s2683_s4 + $0x10] sm:$0xff] }
 0x54d   :  { %v2220_v56 = vpop.eup %2219  ;;  %v910_v57 = vmul.f32 %v2218_v54, %v2536_v24  ;;  %2077 = vmatpush3.msra.mxu0 %v1368_v55  ;;  %2078 = vmatprep.mubr.msk.f32.mxu0 %vm2306_vm5, %v2305_v52  ;;  %v2143_v54 = vpack.c.bf16 %v1697_v51, %v1696_v50  ;;  %v1699_v55 = vld [vmem:[%s2683_s4 + $0x18] sm:$0xff] }
 0x54e   :  { %v909_v58 = vmul.f32 %v2220_v56, %v2538_v25  ;;  %2083 = vmatprep.mubr.msk.f32.mxu1 %vm2306_vm5, %v2305_v52  ;;  %2136 = vmatprep.subr.bf16.mxu0 %v2135_v3  ;;  %v1553_v52 = vld [vmem:[%s2682_s3 + $0x10] sm:$0xff]  ;;  %v2147_v56 = vpack.c.bf16 %v1699_v55, %v1698_v53 }
 0x54f   :  { %2084 = vmatmul.mubr.msk.f32.vlgmr.msra.gmra.mrb[18].mxu1 %vm216_vm6, %v910_v57  ;;  %v2139_v5 = vpack.c.bf16 %v1554_v4, %v1553_v52  ;;  %2144 = vmatprep.subr.bf16.mxu1 %v2143_v54  ;;  %v1787_v57 = vld [vmem:[%s2684_s5] sm:$0xff]  ;;  %v1792_v52 = vld [vmem:[%s2684_s5 + $0x28] sm:$0xff] }
 0x550   :  { %2079 = vmatmul.mubr.msk.f32.vlgmr.msra.gmra.mrb[12].mxu0 %vm216_vm6, %v909_v58  ;;  %2146 = vmatpush3.bf16.msra.mxu1 %v2143_v54  ;;  %v1788_v58 = vld [vmem:[%s2684_s5 + $0x8] sm:$0xff] }
 0x551   :  { %2138 = vmatpush3.bf16.msra.mxu0 %v2135_v3  ;;  %2148 = vmatprep.subr.bf16.mxu1 %v2147_v56  ;;  %v1791_v3 = vld [vmem:[%s2684_s5 + $0x20] sm:$0xff] }
 0x552   :  { %2140 = vmatprep.subr.bf16.mxu0 %v2139_v5  ;;  %v2159_v4 = vpack.c.bf16 %v1792_v52, %v1791_v3 }
 0x554   :  { %2150 = vmatpush3.bf16.msra.mxu1 %v2147_v56 }
 0x555   :  { %2142 = vmatpush3.bf16.msra.mxu0 %v2139_v5 }
 0x5bd   :  { %v983_v59 = vpop.f32.mrb[6].mxu0 }
 0x5be   :  { %v2050_v60 = vpop.f32.mrb[7].mxu0 }
 0x5bf   :  { %v2151_v60 = vpack.c.bf16 %v1788_v58, %v1787_v57 }
 0x5c1   :  { %2152 = vmatprep.subr.bf16.mxu0 %v2151_v60 }
 0x616   :  { %v1059_v6 = vpop.f32.mrb[12].mxu1 }
 0x617   :  { %v1135_v7 = vpop.f32.mrb[8].mxu0  ;;  %v2055_v8 = vpop.f32.mrb[13].mxu1  ;;  %1520 = vrot.lane.b32.xlu0 %v1059_v6, %s2303_s12 }
 0x618   :  { %1524 = vrot.lane.b32.xlu1 %v1135_v7, %s2312_s0  ;;  %v2060_v9 = vpop.f32.mrb[9].mxu0 }
 0x61a   :  { %v1211_v10 = vpop.f32.mrb[14].mxu1 }
 0x61b   :  { %v2065_v11 = vpop.f32.mrb[15].mxu1 }
 0x61c   :  { %1528 = vrot.lane.b32.xlu1 %v1211_v10, %s2313_s25 }
 0x61e   :  { %v1363_v12 = vpop.f32.mrb[16].mxu1 }
 0x61f   :  { %v1287_v13 = vpop.f32.mrb[10].mxu0  ;;  %v2075_v14 = vpop.f32.mrb[17].mxu1  ;;  %1537 = vrot.lane.b32.xlu0 %v1363_v12, %s2303_s12 }
 0x620   :  { %v2070_v15 = vpop.f32.mrb[11].mxu0 }
 0x622   :  { %v1515_v16 = vpop.f32.mrb[18].mxu1 }
 0x623   :  { %v1439_v17 = vpop.f32.mrb[12].mxu0  ;;  %v2085_v18 = vpop.f32.mrb[19].mxu1  ;;  %1545 = vrot.lane.b32.xlu1 %v1515_v16, %s2313_s25 }
 0x624   :  { %1541 = vrot.lane.b32.xlu0 %v1439_v17, %s2312_s0  ;;  %v2080_v19 = vpop.f32.mrb[13].mxu0 }
 0x689   :  { %v1521_v20 = vpop.permute.xlu0 %1520 }
 0x68a   :  { %v1525_v21 = vpop.permute.xlu1 %1524  ;;  %v1531_v22 = vsel %vm216_vm6, %v983_v59, %v1521_v20  ;;  %v1789_v59 = vld [vmem:[%s2684_s5 + $0x10] sm:$0xff] }
 0x68b   :  { %v1533_v24 = vsel %vm1532_vm7, %v1531_v22, %v1525_v21  ;;  %v2155_v63 = vpack.c.bf16 %v1790_v62, %v1789_v59  ;;  %v1684_v21 = vsub.s32 2, %v2406_v34 }
 0x68d   :  { %v1685_v22 = vrot.slane %v2412_v39, %v1684_v21 }
 0x68e   :  { %v1529_v23 = vpop.permute.xlu1 %1528 }
 0x68f   :  { %v1535_v25 = vsel %vm1534_vm8, %v1533_v24, %v1529_v23  ;;  %v1692_v23 = vsub.s32 3, %v2406_v34 }
 0x690   :  { %2094 = vmatprep.mubr.msk.f32.mxu0 %vm57_vm0, %v1535_v25 }
 0x691   :  { %v1538_v26 = vpop.permute.xlu0 %1537 }
 0x692   :  { %v1548_v28 = vsel %vm216_vm6, %v1287_v13, %v1538_v26  ;;  %v1693_v26 = vrot.slane %v2412_v39, %v1692_v23 }
 0x695   :  { %v1546_v27 = vpop.permute.xlu1 %1545 }
 0x696   :  { %v1542_v29 = vpop.permute.xlu0 %1541 }
 0x697   :  { %v1549_v30 = vsel %vm1532_vm7, %v1548_v28, %v1542_v29 }
 0x698   :  { %v1550_v31 = vsel %vm1534_vm8, %v1549_v30, %v1546_v27 }
 0x699   :  { %2095 = vmatmul.mubr.msk.f32.vlgmr.msra.gmra.mrb[14].mxu0 %vm57_vm0, %v1550_v31 }
 0x69a   :  { %2154 = vmatpush3.bf16.msra.mxu0 %v2151_v60 }
 0x69b   :  { %2156 = vmatprep.subr.bf16.mxu0 %v2155_v63 }
 0x69e   :  { %2158 = vmatpush3.bf16.msra.mxu0 %v2155_v63 }
 0x69f   :  { %2160 = vmatprep.subr.bf16.mxu0 %v2159_v4 }
 0x6a2   :  { %2162 = vmatpush3.bf16.msra.mxu0 %v2159_v4 }
 0x76c   :  { %v2096_v2 = vpop.f32.mrb[14].mxu0 }
 0x76d   :  { %v1637_v35 = vadd.f32 %v2096_v2, %v2384_v1  ;;  %v1627_v61 = vpop.f32.mrb[15].mxu0  ;;  %v1794_v2 = vld [vmem:[%s2684_s5 + $0x38] sm:$0xff] }
 0x76e   :  { %v1636_v36 = vadd.f32 %v1627_v61, %v2382_v0  ;;  %v1702_v61 = vsub.s32 6, %v2406_v34 }
 0x76f   :  { %v2597_v37 = vadd.f32 %v1641_v33, %v1637_v35 }
 0x770   :  { %v2599_v38 = vadd.f32 %v1641_v33, %v1636_v36  ;;  %v1793_v33 = vld [vmem:[%s2684_s5 + $0x30] sm:$0xff]  ;;  %v1703_v36 = vrot.slane %v2412_v39, %v1702_v61  ;;  %s2314_s5 = smov [#allocation7]  }
 0x771   :  { %v1647_v40 = vsel %vm57_vm0, %v2597_v37, 0.0  ;;  %v2163_v35 = vpack.c.bf16 %v1794_v2, %v1793_v33  ;;  %s1890_s24 = sshll.u32 %s2314_s5, 4  ;;  %s1891_s24 = int_to_ptr.vmem [resolvable:$true] %s1890_s24 }
 0x772   :  { %1648 = vadd.xlane.f32.xlu1 %v1647_v40  ;;  %v1644_v41 = vsel %vm57_vm0, %v2599_v38, 0.0  ;;  %s2273_s0 = scalar_lea.vmem %s1891_s24, 256  ;;  %p2278_p3 = scmp.lt.s32.totalorder %s1891_s24, %s1891_s24 }
 0x773   :  { %1645 = vadd.xlane.f32.xlu0 %v1644_v41  ;;  %2164 = vmatprep.subr.bf16.mxu0 %v2163_v35  ;;  %p2274_p2 = scmp.ne.s32.totalorder %s1891_s24, %s2273_s0  ;;  %p2279_p4 = scmp.lt.s32.totalorder %s2273_s0, %s2273_s0 }
 0x774   :  { %2166 = vmatpush3.bf16.msra.mxu0 %v2163_v35 }
 0x775   :  { %p2280_p5 = por %p2279_p4, %p2278_p3 }
 0x777   :  { %p2281_p6 = pnand %p2280_p5, %p2274_p2 }
 0x7ff   :  { %v1649_v42 = vpop.xlane.xlu1 %1648 }
 0x800   :  { %v1651_v43 = vmul.f32 0.03125, %v1649_v42  ;;  %v1646_v44 = vpop.xlane.xlu0 %1645 }
 0x801   :  { %v1650_v45 = vmul.f32 0.03125, %v1646_v44 }
 0x802   :  { %v2606_v1 = vsub.f32 %v2597_v37, %v1651_v43 }
 0x803   :  { %v1652_v0 = vsub.f32 %v2599_v38, %v1650_v45 }
 0x804   :  { %v1655_v48 = vmul.f32 %v2606_v1, %v2606_v1 }
 0x805   :  { %v1654_v46 = vmul.f32 %v1652_v0, %v1652_v0 }
 0x806   :  { %v1659_v49 = vsel %vm57_vm0, %v1655_v48, 0.0 }
 0x807   :  { %v1656_v47 = vsel %vm57_vm0, %v1654_v46, 0.0 }
 0x808   :  { %1657 = vadd.xlane.f32.xlu0 %v1656_v47 }
 0x80c   :  { %1660 = vadd.xlane.f32.xlu0 %v1659_v49 }
 0x895   :  { %v1658_v5 = vpop.xlane.xlu0 %1657 }
 0x896   :  { %v1662_v6 = vmul.f32 0.032258064, %v1658_v5 }
 0x898   :  { %2221 = vrsqrt.f32 %v1662_v6  ;;  %vm1666_vm9 = vcmp.eq.f32.partialorder %v1662_v6, inf  ;;  %v1669_v11 = vand.u32 2147483648, %v1662_v6  ;;  %vm1668_vm10 = vcmp.eq.f32.partialorder %v1662_v6, 0.0 }
 0x899   :  { %v1661_v7 = vpop.xlane.xlu0 %1660 }
 0x89a   :  { %v1663_v8 = vmul.f32 0.032258064, %v1661_v7 }
 0x89c   :  { %2223 = vrsqrt.f32 %v1663_v8  ;;  %vm1673_vm11 = vcmp.eq.f32.partialorder %v1663_v8, inf  ;;  %v1676_v17 = vand.u32 2147483648, %v1663_v8  ;;  %vm1675_vm12 = vcmp.eq.f32.partialorder %v1663_v8, 0.0 }
 0x8a2   :  { %v2222_v9 = vpop.eup %2221 }
 0x8a3   :  { %v1665_v10 = vmul.f32 %v2222_v9, %v1662_v6 }
 0x8a5   :  { %v1667_v12 = vsel %vm1666_vm9, %v1662_v6, %v1665_v10 }
 0x8a6   :  { %v2224_v13 = vpop.eup %2223  ;;  %v1670_v14 = vsel %vm1668_vm10, %v1669_v11, %v1667_v12 }
 0x8a7   :  { %v1678_v15 = vadd.f32 1e-06, %v1670_v14  ;;  %v1672_v16 = vmul.f32 %v2224_v13, %v1663_v8 }
 0x8a9   :  { %2225 = vrcp.f32 %v1678_v15  ;;  %v1674_v18 = vsel %vm1673_vm11, %v1663_v8, %v1672_v16 }
 0x8aa   :  { %v1677_v19 = vsel %vm1675_vm12, %v1676_v17, %v1674_v18 }
 0x8ab   :  { %v1679_v20 = vadd.f32 1e-06, %v1677_v19 }
 0x8ad   :  { %2227 = vrcp.f32 %v1679_v20 }
 0x8b3   :  { %v2226_v24 = vpop.eup %2225 }
 0x8b4   :  { %v1686_v25 = vmul.f32 %v2226_v24, %v1685_v22 }
 0x8b6   :  { %v1688_v27 = vmul.f32 %v1686_v25, %v1652_v0 }
 0x8b7   :  { %v2228_v28 = vpop.eup %2227 }
 0x8b8   :  { %v1687_v29 = vmul.f32 %v2228_v28, %v1685_v22  ;;  %v1694_v30 = vadd.f32 %v1693_v26, %v1688_v27 }
 0x8ba   :  { %v1689_v31 = vmul.f32 %v1687_v29, %v2606_v1  ;;  %2105 = vmatprep.mubr.msk.f32.mxu1 %vm57_vm0, %v1694_v30  ;;  %v1797_v1 = vsub.s32 5, %v2406_v34 }
 0x8bc   :  { %v1695_v32 = vadd.f32 %v1693_v26, %v1689_v31  ;;  %v1798_v0 = vrot.slane %v2412_v39, %v1797_v1 }
 0x8be   :  { %2106 = vmatmul.mubr.msk.f32.vlgmr.msra.gmra.mrb[20].mxu1 %vm57_vm0, %v1695_v32 }
 0x991   :  { %v2107_v40 = vpop.f32.mrb[20].mxu1 }
 0x992   :  { %v1782_v41 = vadd.f32 %v2107_v40, %v1703_v36  ;;  %v1776_v42 = vpop.f32.mrb[21].mxu1 }
 0x993   :  { %v1777_v43 = vadd.f32 %v1776_v42, %v1703_v36 }
 0x994   :  { %v1786_v45 = vmax.f32 %v1782_v41, 0.0 }
 0x995   :  { %v1785_v44 = vmax.f32 %v1777_v43, 0.0 }
 0x997   :  { %2124 = vmatprep.mubr.msk.f32.mxu0 %vm1799_vm13, %v1785_v44 }
 0x998   :  { %2125 = vmatmul.mubr.msk.f32.vlgmr.msra.gmra.mrb[16].mxu0 %vm1799_vm13, %v1786_v45 }
 0xa6b   :  { %v2126_v46 = vpop.f32.mrb[16].mxu0 }
 0xa6c   :  { %v1878_v47 = vadd.f32 %v2126_v46, %v1798_v0  ;;  %v1872_v48 = vpop.f32.mrb[17].mxu0 }
 0xa6d   :  { %v1873_v49 = vadd.f32 %v1872_v48, %v1798_v0 }
 0xa6e   :  { %v1882_v50 = vadd.f32 %v1878_v47, %v2597_v37 }
 0xa6f   :  { %v1881_v51 = vadd.f32 %v1873_v49, %v2599_v38 }
 0xa70   :  { %1884 = vst.msk [vmem:[#allocation7 + $0x8] sm:$0xff] %vm57_vm0, %v1882_v50 }
 0xa71   :  { %1883 = vst.msk [vmem:[#allocation7] sm:$0xff] %vm57_vm0, %v1881_v51 }
 0xa72   :  { %2284 = shalt.err (!%p2281_p6)
}
 0xa73   :  { %s2285_s1 = scalar_lea.hbm %s2686_s7, 256 }
 0xa74   :  { %p2286_p7 = scmp.ne.s32.totalorder %s2686_s7, %s2285_s1  ;;  %p2289_p8 = scmp.lt.u32.totalorder %s2285_s1, %s2686_s7 }
 0xa76   :  { %p2291_p9 = pnand %p2289_p8, %p2286_p7 }
 0xa78   :  { %2294 = shalt.err (!%p2291_p9)
}
 0xa79   :  { %1896 = dma.vmem_to_hbm [thread:$0]  %s1891_s24, 256, %s2686_s7, [#allocation4], %s2302_s11, %s2302_s11, %s2303_s12  }
 0xa7a   :  { %2299 = dma.done.wait [#allocation4], 256  }
 0xa7b   :  { %2300 = vsyncadd [#allocation4], 4294967040 }
 0xa7c   :  { %1900 = vsyncpa [#allocation3], 1 }
 0xa7d   :  { %1901 = vsyncpa [#allocation6], 1 }
 0xa7e   :  { %1902 = vsyncpa [#allocation4], 1 }

</bundles_post_ra>
